<compile_context>
chip_gen: v6e
topology: v6e:2x2x1
jax: 0.10.0
libtpu: 0.0.40
codegen_flags: <defaults>
</compile_context>

<pallas_src>
import math

import jax
import jax.numpy as jnp
from jax.experimental import pallas as pl
from jax.experimental.pallas import tpu as pltpu

HIDDEN = 768          # RoBERTa-base hidden size
FEATURE_SIZE = 128    # NLPModel feature_size
DROPOUT_P = 0.5       # NLPModel nlp_dropout (training-mode semantics, module default)
EPS = 1e-12           # torch F.normalize default eps
_KEEP_THRESHOLD = int(round(DROPOUT_P * 256))   # uint8 bits >= T  <=>  keep (prob = 1-p)
_DROPOUT_SCALE = 1.0 / (1.0 - DROPOUT_P)


def nlp_head_kernel(x_ref, w_ref, bits_ref, o_ref):
    # x_ref:    [TB, H]  bf16 CLS features (tiled over batch)
    # w_ref:    [H,  F]  bf16 projection weight (resident, constant index_map)
    # bits_ref: [TB, F]  uint8 dropout bits (tiled over batch)
    # o_ref:    [TB, F]  f32 output
    x = x_ref[...]                                             # bf16

    # --- F.normalize(x, p=2, dim=1) folded into a post-matmul per-row scale ---
    # inv = 1 / max(||x||_2, eps) == rsqrt(max(sum(x*x), eps^2)); accumulate in f32.
    xf = x.astype(jnp.float32)
    sq = jnp.sum(xf * xf, axis=1, keepdims=True)               # [TB, 1] f32
    inv = jax.lax.rsqrt(jnp.maximum(sq, EPS * EPS))            # EUP, free slot
    inv = inv * _DROPOUT_SCALE                                 # fold dropout 1/(1-p) scale

    # --- Linear(768 -> F, bias=False): bf16 operands, f32 accumulate on the MXU ---
    y = jnp.dot(x, w_ref[...], preferred_element_type=jnp.float32)   # [TB, F] f32

    # --- Dropout(p), training mode: integer-threshold keep mask ---
    keep = bits_ref[...].astype(jnp.int32) >= _KEEP_THRESHOLD
    o_ref[...] = jnp.where(keep, y * inv, 0.0).astype(o_ref.dtype)


def _pick_tile_b(B, max_tile=512):
    """Batch tile: multiple of 32 (uint8/bf16 sublane packing), ~B/2 so the grid has
    >=2 steps for v7x megacore sharding, capped at max_tile (v5e scoped-VMEM safe)."""
    half = max(1, (B + 1) // 2)
    t = ((half + 31) // 32) * 32
    return max(32, min(t, max_tile))


def nlp_head(x, w_t_bf16, rand_bits, *, tile_b=None):
    """x: [B, HIDDEN] CLS features (bf16 preferred; f32 is cast); w_t_bf16: [HIDDEN, F]
    bf16 (pre-transposed torch Linear weight); rand_bits: [B, F] uint8 dropout bits."""
    B, H = x.shape
    F = w_t_bf16.shape[1]
    if tile_b is None:
        tile_b = _pick_tile_b(B)

    if x.dtype != jnp.bfloat16:
        # Prefer handing bf16 straight from the encoder; casting here adds an XLA pass.
        x = x.astype(jnp.bfloat16)

    # Pad batch to a multiple of the tile; zero rows produce exactly-zero outputs.
    n_tiles = (B + tile_b - 1) // tile_b
    Bp = n_tiles * tile_b
    if Bp != B:
        x = jnp.pad(x, ((0, Bp - B), (0, 0)))
        rand_bits = jnp.pad(rand_bits, ((0, Bp - B), (0, 0)))

    out = pl.pallas_call(
        nlp_head_kernel,
        out_shape=jax.ShapeDtypeStruct((Bp, F), jnp.float32),
        grid=(n_tiles,),
        in_specs=[
            pl.BlockSpec((tile_b, H), lambda i: (i, 0)),   # bf16 features, tiled over batch
            pl.BlockSpec((H, F), lambda i: (0, 0)),        # bf16 weight, resident
            pl.BlockSpec((tile_b, F), lambda i: (i, 0)),   # uint8 dropout bits
        ],
        out_specs=pl.BlockSpec((tile_b, F), lambda i: (i, 0)),   # lane-dense [TB, 128]
        compiler_params=pltpu.CompilerParams(
            dimension_semantics=("parallel",),             # megacore-shard the batch axis
        ),
    )(x, w_t_bf16, rand_bits)
    return out[:B]


if __name__ == "__main__":
    key = jax.random.PRNGKey(0)
    k_feat, k_w, k_drop = jax.random.split(key, 3)

    # Small batch of "sentences": simulated RoBERTa CLS hidden states [B, 768] in bf16.
    B = 64
    x = jax.random.normal(k_feat, (B, HIDDEN), dtype=jnp.float32).astype(jnp.bfloat16)

    # Deterministic Linear(768, 128, bias=False) init (Kaiming-uniform-like bound).
    bound = 1.0 / math.sqrt(HIDDEN)
    w_torch = jax.random.uniform(
        k_w, (FEATURE_SIZE, HIDDEN), dtype=jnp.float32, minval=-bound, maxval=bound
    )
    w_t = w_torch.T.astype(jnp.bfloat16)   # [HIDDEN, FEATURE_SIZE], bf16

    # Host-side dropout bits (one uint8 per output element).
    rand_bits = jax.random.bits(k_drop, (B, FEATURE_SIZE), dtype=jnp.uint8)

    out = nlp_head(x, w_t, rand_bits)
    jax.block_until_ready(out)
    assert out.shape == (B, FEATURE_SIZE)
    assert bool(jnp.all(jnp.isfinite(out)))

    # Pure-JAX reference (same bf16 inputs), generous tolerance for bf16 matmul.
    xf = x.astype(jnp.float32)
    feat = xf / jnp.maximum(jnp.sqrt(jnp.sum(xf * xf, axis=1, keepdims=True)), EPS)
    ref = feat @ w_t.astype(jnp.float32)
    keep = rand_bits.astype(jnp.int32) >= _KEEP_THRESHOLD
    ref = jnp.where(keep, ref * _DROPOUT_SCALE, 0.0)
    assert bool(jnp.allclose(out, ref, atol=5e-2, rtol=5e-2))

    print("KERNEL_OK")
</pallas_src>

<mosaic_0001>
module attributes {stable_mosaic.version = 11 : i64} {
  func.func @nlp_head_kernel(%arg0: i32, %arg1: memref<32x768xbf16, #tpu.memory_space<vmem>>, %arg2: memref<768x128xbf16, #tpu.memory_space<vmem>>, %arg3: memref<32x128xi8, #tpu.memory_space<vmem>>, %arg4: memref<32x128xf32, #tpu.memory_space<vmem>>) attributes {dimension_semantics = [#tpu.dimension_semantics<parallel>], iteration_bounds = array<i64: 2>, scalar_prefetch = 0 : i64, scratch_operands = 0 : i64, tpu.core_type = #tpu.core_type<tc>, window_params = [{transform_indices = @transform_0, window_bounds = array<i64: 32, 768>}, {pipeline_mode = #tpu.pipeline_mode<synchronous>, transform_indices = @transform_1, window_bounds = array<i64: 768, 128>}, {transform_indices = @transform_2, window_bounds = array<i64: 32, 128>}, {transform_indices = @transform_3, window_bounds = array<i64: 32, 128>}]} {
    %c0 = arith.constant 0 : index
    %c0_0 = arith.constant 0 : index
    %0 = vector.load %arg1[%c0, %c0_0] : memref<32x768xbf16, #tpu.memory_space<vmem>>, vector<32x768xbf16>
    %1 = arith.extf %0 : vector<32x768xbf16> to vector<32x768xf32>
    %2 = arith.mulf %1, %1 : vector<32x768xf32>
    %cst = arith.constant dense<0.000000e+00> : vector<32xf32>
    %3 = vector.multi_reduction <add>, %2, %cst [1] : vector<32x768xf32> to vector<32xf32>
    %4 = vector.shape_cast %3 : vector<32xf32> to vector<32x1xf32>
    %cst_1 = arith.constant 1.000000e-24 : f32
    %5 = vector.broadcast %cst_1 : f32 to vector<32x1xf32>
    %6 = arith.maximumf %4, %5 : vector<32x1xf32>
    %7 = math.rsqrt %6 : vector<32x1xf32>
    %cst_2 = arith.constant 2.000000e+00 : f32
    %8 = vector.broadcast %cst_2 : f32 to vector<32x1xf32>
    %9 = arith.mulf %7, %8 : vector<32x1xf32>
    %c0_3 = arith.constant 0 : index
    %c0_4 = arith.constant 0 : index
    %10 = vector.load %arg2[%c0_3, %c0_4] : memref<768x128xbf16, #tpu.memory_space<vmem>>, vector<768x128xbf16>
    %cst_5 = arith.constant dense<0.000000e+00> : vector<32x128xf32>
    %11 = tpu.matmul %0, %10, %cst_5 {dimension_numbers = #tpu.dot_dimension_numbers<[1], [0], [0], [1], [0, 0, 1, 1], [], []>} : vector<32x768xbf16>, vector<768x128xbf16>, vector<32x128xf32> -> vector<32x128xf32>
    %c0_6 = arith.constant 0 : index
    %c0_7 = arith.constant 0 : index
    %12 = vector.load %arg3[%c0_6, %c0_7] : memref<32x128xi8, #tpu.memory_space<vmem>>, vector<32x128xi8>
    %13 = arith.extui %12 : vector<32x128xi8> to vector<32x128xi32>
    %c128_i32 = arith.constant 128 : i32
    %14 = vector.broadcast %c128_i32 : i32 to vector<32x128xi32>
    %15 = arith.cmpi sge, %13, %14 : vector<32x128xi32>
    %16 = vector.broadcast %9 : vector<32x1xf32> to vector<32x128xf32>
    %17 = arith.mulf %11, %16 : vector<32x128xf32>
    %cst_8 = arith.constant 0.000000e+00 : f32
    %18 = vector.broadcast %cst_8 : f32 to vector<32x128xf32>
    %19 = arith.select %15, %17, %18 : vector<32x128xi1>, vector<32x128xf32>
    %c0_9 = arith.constant 0 : index
    %c0_10 = arith.constant 0 : index
    %20 = vector.load %arg4[%c0_9, %c0_10] : memref<32x128xf32, #tpu.memory_space<vmem>>, vector<32x128xf32>
    tpu.vector_store %arg4[%c0_9, %c0_10], %19 {strides = array<i32>} : memref<32x128xf32, #tpu.memory_space<vmem>>, vector<32x128xf32>,
    return
  }
  func.func @transform_0(%arg0: i32) -> (i32, i32) {
    %c0_i32 = arith.constant 0 : i32
    %c0_i32_0 = arith.constant 0 : i32
    return %arg0, %c0_i32 : i32, i32
  }
  func.func @transform_1(%arg0: i32) -> (i32, i32) {
    %c0_i32 = arith.constant 0 : i32
    %c0_i32_0 = arith.constant 0 : i32
    %c0_i32_1 = arith.constant 0 : i32
    return %c0_i32, %c0_i32_0 : i32, i32
  }
  func.func @transform_2(%arg0: i32) -> (i32, i32) {
    %c0_i32 = arith.constant 0 : i32
    %c0_i32_0 = arith.constant 0 : i32
    return %arg0, %c0_i32 : i32, i32
  }
  func.func @transform_3(%arg0: i32) -> (i32, i32) {
    %c0_i32 = arith.constant 0 : i32
    %c0_i32_0 = arith.constant 0 : i32
    return %arg0, %c0_i32 : i32, i32
  }
}

</mosaic_0001>

<bundles_post_ra>
// kernel: tpu_custom_call.1
= control target key start
LH: loop header
LB: loop body
LE: loop exit
PB: predicated region body
PF: predicated region fallthrough
CT: control target
= control target key end

     0   :  { %8 = vsyncpa [#allocation3], 0  ;;  %s1857_s0 = inlined_call_operand.hbm [shape: bf16[64,768], index: 0, kind: input, shape index: {}]   ;;  %s1858_s1 = inlined_call_operand.hbm [shape: bf16[768,128], index: 1, kind: input, shape index: {}]   ;;  %s1859_s2 = inlined_call_operand.hbm [shape: u8[64,128], index: 2, kind: input, shape index: {}]   ;;  %s1860_s3 = inlined_call_operand.hbm [shape: f32[64,128], index: 3, kind: output, shape index: {}]  }
   0x1   :  { %10 = vsyncpa [#allocation3 + $0x1], 0 }
   0x2   :  { %11 = vsyncpa [#allocation6], 0 }
   0x3   :  { %12 = vsyncpa [#allocation4], 0 }
   0x4   :  { %14 = vsyncpa [#allocation4 + $0x1], 0  ;;  %s1579_s12 = smov 0   ;;  %s1581_s13 = smov 0  }
   0x5   :  { %s1583_s14 = smov 0   ;;  %s1585_s15 = smov 0  }
   0x6 LB: > { %s1600_s16 = sadd.s32 1, %s1547_s15   ;;  %s27_s17 = sadd.s32 1, %s1543_s14  ;;  %s1547_s15 = sphi %s1585_s15, %s1882_s15   ;;  %s1543_s14 = sphi %s1583_s14, %s1881_s14   ;;  %s1539_s13 = sphi %s1581_s13, %s1880_s13   ;;  %s1535_s12 = sphi %s1579_s12, %s1879_s12  }
   0x7   : > { %s24_s18 = ssub.s32 %s1547_s15, %s1600_s16  ;;  %p34_p0 = scmp.ne.s32.totalorder %s1543_s14, %s1539_s13 }
   0x8   : > { %p25_p1 = scmp.eq.s32.totalorder %s24_s18, 0  ;;  %p35_p2 = scmp.eq.s32.totalorder %s1547_s15, 0 }
   0x9   : > { %p1283_p4 = scmp.lt.s32.totalorder %s1547_s15, 2  ;;  %s150_s20 = sand.u32 1, %s1547_s15  }
   0xa   : > { %s1611_s19 = scalar_select %p25_p1, %s1543_s14, %s27_s17  }
   0xb   : > { %p36_p5 = por %p35_p2, %p34_p0  ;;  %s152_s21 = sand.u32 1, %s1543_s14  }
   0xc   : > { %s1254_s22 = smul.u32 96, %s152_s21  ;;  %s1632_s30 = scalar_lea.sflag [#allocation3], %s150_s20 }
   0xd   : > { %p1620_p6 = pnand %p1283_p4, %p36_p5  ;;  %s1255_s24 = smul.u32 1536, %s1547_s15 }
   0xe   : > { %s154_s28 = scalar_lea.vmem [#allocation2], %s1254_s22  ;;  %s1398_s7 = scalar_lea.hbm %s1857_s0, 3072 }
   0xf   : > { %s1628_s27 = scalar_lea.hbm %s1857_s0, %s1255_s24  ;;  %s162_s29 = sshll.u32 %s154_s28, 4  ;;  %s1630_s29 = int_to_ptr.vmem [resolvable:$true] %s162_s29 }
  0x10   : > { %s1393_s4 = scalar_lea.hbm %s1628_s27, 1536  ;;  %p1862_p8 = pneg %p1620_p6 }
  0x11   : > { %p1394_p7 = scmp.ne.s32.totalorder %s1628_s27, %s1393_s4  ;;  %p1399_p11 = scmp.lt.s32.totalorder %s1628_s27, %s1857_s0 }
  0x12   : > { %p1400_p12 = scmp.lt.s32.totalorder %s1398_s7, %s1393_s4 }
  0x13   : > { %p1396_p9 = pnand %p1862_p8, %p1394_p7 }
  0x14   : > { %p1401_p13 = por %p1400_p12, %p1399_p11 }
  0x15   : > { %p1397_p10 = pneg %p1396_p9 }
  0x17   : > { %p1402_p1 = pnand %p1401_p13, %p1397_p10 }
  0x19   : > { %1405 = shalt.err (!%p1402_p1)
}
  0x1a   : > { %s1406_s10 = scalar_lea.vmem %s1630_s29, 1536  ;;  %s1549_s11 = smov [#allocation2]  }
  0x1b   : > { %p1407_p2 = scmp.ne.s32.totalorder %s1630_s29, %s1406_s10  ;;  %s1411_s17 = sshll.u32 %s1549_s11, 4  ;;  %s1412_s17 = int_to_ptr.vmem [resolvable:$false] %s1411_s17 }
  0x1c   : > { %s1413_s18 = scalar_lea.vmem %s1412_s17, 3072  ;;  %p1414_p7 = scmp.lt.s32.totalorder %s1630_s29, %s1412_s17 }
  0x1d   : > { %p1409_p4 = pnand %p1407_p2, %p1862_p8  ;;  %p1415_p9 = scmp.lt.s32.totalorder %s1413_s18, %s1406_s10 }
  0x1f   : > { %p1410_p5 = pneg %p1409_p4  ;;  %p1416_p3 = por %p1415_p9, %p1414_p7 }
  0x21   : > { %p1417_p11 = pnand %p1416_p3, %p1410_p5 }
  0x23   : > { %1420 = shalt.err (!%p1417_p11)
}
  0x24   : > { %s1550_s20 = smov 384   ;;  %s1551_s22 = smov 24  }
  0x25   : > { %1274 = dma.hbm_to_vmem [thread:$0]  (!%p1620_p6), %s1628_s27, 1536, %s1630_s29, %s1632_s30, %s1550_s20, %s1550_s20, %s1551_s22  }
  0x26   : > { %s1660_s24 = sadd.s32 4294967295, %s1547_s15   ;;  %s1075_s25 = sadd.s32 4294967294, %s1547_s15  }
  0x27   : > { %p40_p3 = scmp.ne.s32.totalorder %s1539_s13, %s1535_s12  ;;  %p1861_p10 = scmp.eq.s32.totalorder %s1660_s24, 0 }
  0x28   : > { %p111_p12 = scmp.eq.s32.totalorder %s1660_s24, 1  ;;  %p117_p13 = scmp.eq.s32.totalorder %s1075_s25, 1 }
  0x29   : > { %p1669_p1 = por %p1861_p10, %p40_p3  ;;  %p1076_p2 = scmp.ge.s32.totalorder %s1547_s15, 1 }
  0x2a   : > { %p1677_p4 = por %p111_p12, %p34_p0  ;;  %p1681_p5 = por %p117_p13, %p40_p3 }
  0x2b   : > { %s1866_s26 = scalar_select %p1669_p1, 1, 0 }
  0x2c   : > { %s1867_s27 = scalar_select %p1677_p4, 1, 0 }
  0x2d   : > { %s1868_s28 = scalar_select %p1681_p5, 1, 0 }
  0x2e   : > { %p124_p7 = scmp.lt.s32.totalorder %s1547_s15, 3  ;;  %s1552_s4 = smov [#allocation5]  }
  0x2f   : > { %s136_s5 = sshll.u32 %s1552_s4, 4  ;;  %s1082_s6 = sshll.u32 %s152_s21, 3  ;;  %s137_s5 = int_to_ptr.vmem [resolvable:$true] %s136_s5 }
  0x30   : > { %p1686_p9 = pnand %p1076_p2, %p124_p7  ;;  %s1083_s7 = sshll.u32 %s1547_s15, 7 }
  0x31   : > { %s1704_s11 = scalar_lea.hbm %s1859_s2, %s1083_s7  ;;  %s176_s17 = scalar_lea.vmem [#allocation7], %s1082_s6 }
  0x32   : > { %p1267_p11 = pneg %p1686_p9  ;;  %s183_s18 = sshll.u32 %s176_s17, 4  ;;  %s1706_s18 = int_to_ptr.vmem [resolvable:$true] %s183_s18 }
  0x33   : > { %s1432_s20 = scalar_lea.vmem %s137_s5, 6144  ;;  %p1440_p7 = scmp.lt.s32.totalorder %s137_s5, %s137_s5 }
  0x34   : > { %p1697_p0 = pnand %p1267_p11, %p1861_p10  ;;  %p1433_p12 = scmp.ne.s32.totalorder %s137_s5, %s1432_s20 }
  0x35   : > { %p1441_p11 = scmp.lt.s32.totalorder %s1432_s20, %s1432_s20 }
  0x36   : > { %p1423_p3 = pneg %p1697_p0 }
  0x37   : > { %p1442_p10 = por %p1441_p11, %p1440_p7 }
  0x38   : > { %p1435_p13 = pnand %p1433_p12, %p1423_p3 }
  0x3a   : > { %p1436_p2 = pneg %p1435_p13 }
  0x3c   : > { %p1443_p8 = pnand %p1442_p10, %p1436_p2 }
  0x3e   : > { %1446 = shalt.err (!%p1443_p8)
}
  0x3f   : > { %s1553_s21 = smov 64   ;;  %s1554_s22 = smov 4  }
  0x40   : > { %1270 = dma.hbm_to_vmem [thread:$0]  (!%p1697_p0), %s1858_s1, 6144, %s137_s5, [#allocation6], %s1553_s21, %s1553_s21, %s1554_s22  }
  0x41   : > { %s1447_s6 = scalar_lea.hbm %s1704_s11, 128  ;;  %p1871_p12 = pneg %p1620_p6 }
  0x42   : > { %p1448_p3 = scmp.ne.s32.totalorder %s1704_s11, %s1447_s6  ;;  %s1452_s10 = scalar_lea.hbm %s1859_s2, 256 }
  0x43   : > { %p1453_p8 = scmp.lt.s32.totalorder %s1704_s11, %s1859_s2  ;;  %p1454_p10 = scmp.lt.s32.totalorder %s1452_s10, %s1447_s6 }
  0x44   : > { %p1450_p13 = pnand %p1448_p3, %p1871_p12 }
  0x45   : > { %p1455_p2 = por %p1454_p10, %p1453_p8 }
  0x46   : > { %p1451_p7 = pneg %p1450_p13 }
  0x48   : > { %p1456_p11 = pnand %p1455_p2, %p1451_p7 }
  0x4a   : > { %1459 = shalt.err (!%p1456_p11)
}
  0x4b   : > { %s1460_s5 = scalar_lea.vmem %s1706_s18, 128  ;;  %p1872_p3 = pmov %p1871_p12 }
  0x4c   : > { %p1461_p0 = scmp.ne.s32.totalorder %s1706_s18, %s1460_s5  ;;  %s1555_s8 = smov [#allocation7]  }
  0x4d   : > { %s1465_s21 = sshll.u32 %s1555_s8, 4  ;;  %s1466_s21 = int_to_ptr.vmem [resolvable:$false] %s1465_s21 }
  0x4e   : > { %p1463_p12 = pnand %p1461_p0, %p1872_p3  ;;  %s1467_s22 = scalar_lea.vmem %s1466_s21, 256 }
  0x4f   : > { %p1468_p5 = scmp.lt.s32.totalorder %s1706_s18, %s1466_s21  ;;  %p1469_p4 = scmp.lt.s32.totalorder %s1467_s22, %s1460_s5 }
  0x50   : > { %p1464_p13 = pneg %p1463_p12 }
  0x51   : > { %p1470_p1 = por %p1469_p4, %p1468_p5 }
  0x53   : > { %p1471_p8 = pnand %p1470_p1, %p1464_p13 }
  0x55   : > { %1474 = shalt.err (!%p1471_p8)
}
  0x56   : > { %1277 = dma.hbm_to_vmem [thread:$0]  (!%p1620_p6), %s1704_s11, 128, %s1706_s18, %s1632_s30  }
  0x57   : > { %192 = sbr.rel (%p1686_p9) target bundleno = 386 (0x182), region = 32  ;;  %s194_s25 = sand.u32 (!%p1686_p9), 1, %s1660_s24  }
  0x58   : > { %s1742_s4 = sand.u32 (!%p1686_p9), 1, %s1539_s13   ;;  %s195_s7 = scalar_lea.sflag (!%p1686_p9), [#allocation3], %s194_s25 }
  0x59   : > { %s1256_s6 = smul.u32 (!%p1686_p9), 96, %s1742_s4  ;;  %p1873_p1 = scmp.ne.s32.totalorder (!%p1686_p9), %s1866_s26, 0 }
  0x5b   : > { %s1745_s9 = scalar_lea.vmem (!%p1686_p9), [#allocation2], %s1256_s6 }
  0x5c   : > { %1518 = dma.done.wait (%p1873_p1), %s195_s7, 1536  }
  0x5d   : > { %1520 = vsyncadd (%p1873_p1), %s195_s7, 4294965760  ;;  %p1874_p6 = scmp.eq.s32.totalorder %s1660_s24, 0 }
  0x5f   : > { %1522 = dma.done.wait (%p1874_p6), [#allocation6], 6144   ;;  %p1875_p4 = pmov %p1874_p6 }
  0x60   : > { %s1086_s23 = sshll.u32 %s1742_s4, 3 }
  0x61   : > { %1524 = vsyncadd (%p1875_p4), [#allocation6], 4294961152  ;;  %s1756_s30 = scalar_lea.vmem [#allocation7], %s1086_s23 }
  0x62   : > { %1526 = dma.done.wait (%p1873_p1), %s195_s7, 128  }
  0x63   : > { %1528 = vsyncadd (%p1873_p1), %s195_s7, 4294967168  ;;  %v1325_v0 = vld [vmem:[#allocation5 + $0x78] sm:$0xff]   ;;  %v1329_v4 = vld [vmem:[#allocation5 + $0x70] sm:$0xff]   ;;  %s1087_s26 = sshll.u32 %s1742_s4, 5  ;;  %s1153_s18 = sshll.u32 %s1660_s24, 9 }
  0x64   : > { %v1326_v1 = vld [vmem:[#allocation5 + $0xf8] sm:$0xff]   ;;  %1154 = vmatprep.subr.bf16.mxu0 %v1325_v0  ;;  %v1330_v5 = vld [vmem:[#allocation5 + $0xf0] sm:$0xff]   ;;  %v1333_v8 = vld [vmem:[#allocation5 + $0x68] sm:$0xff]   ;;  %s238_s29 = scalar_lea.vmem [#allocation8], %s1087_s26  ;;  %s1814_s17 = scalar_lea.hbm %s1860_s3, %s1153_s18 }
  0x65   : > { %v1327_v2 = vld [vmem:[#allocation5 + $0x38] sm:$0xff]   ;;  %1182 = vmatprep.subr.bf16.mxu1 %v1326_v1  ;;  %v1331_v6 = vld [vmem:[#allocation5 + $0x30] sm:$0xff]   ;;  %v1334_v9 = vld [vmem:[#allocation5 + $0xe8] sm:$0xff]   ;;  %s972_s11 = sshll.u32 %s238_s29, 4  ;;  %s959_s20 = scalar_lea.sflag [#allocation4], %s1742_s4  ;;  %s1809_s11 = int_to_ptr.vmem [resolvable:$true] %s972_s11 }
  0x66   : > { %v1328_v3 = vld [vmem:[#allocation5 + $0xb8] sm:$0xff]   ;;  %1155 = vmatpush3.bf16.msra.mxu0 %v1327_v2  ;;  %v1332_v7 = vld [vmem:[#allocation5 + $0xb0] sm:$0xff]   ;;  %v1335_v10 = vld [vmem:[#allocation5 + $0x28] sm:$0xff]   ;;  %s1475_s5 = scalar_lea.vmem %s1809_s11, 512  ;;  %p1876_p9 = scmp.ne.s32.totalorder %s1867_s27, 0 }
  0x67   : > { %1183 = vmatpush3.bf16.msra.mxu1 %v1328_v3  ;;  %1156 = vmatprep.subr.bf16.mxu0 %v1329_v4  ;;  %v1336_v11 = vld [vmem:[#allocation5 + $0xa8] sm:$0xff]   ;;  %v1337_v12 = vld [vmem:[#allocation5 + $0x60] sm:$0xff]   ;;  %v1341_v16 = vld [vmem:[#allocation5 + $0x58] sm:$0xff]   ;;  %p1476_p5 = scmp.ne.s32.totalorder %s1809_s11, %s1475_s5  ;;  %s1556_s8 = smov [#allocation8]  }
  0x68   : > { %1184 = vmatprep.subr.bf16.mxu1 %v1330_v5  ;;  %v1338_v13 = vld [vmem:[#allocation5 + $0xe0] sm:$0xff]   ;;  %v1342_v17 = vld [vmem:[#allocation5 + $0xd8] sm:$0xff]   ;;  %v1345_v20 = vld [vmem:[#allocation5 + $0x50] sm:$0xff]   ;;  %s1479_s21 = sshll.u32 %s1556_s8, 4  ;;  %s1480_s21 = int_to_ptr.vmem [resolvable:$false] %s1479_s21 }
  0x69   : > { %v1339_v14 = vld [vmem:[#allocation5 + $0x20] sm:$0xff]   ;;  %v1343_v18 = vld [vmem:[#allocation5 + $0x18] sm:$0xff]   ;;  %v1346_v21 = vld [vmem:[#allocation5 + $0xd0] sm:$0xff]   ;;  %p1477_p7 = pnand %p1476_p5, %p1876_p9  ;;  %s1481_s22 = scalar_lea.vmem %s1480_s21, 1024 }
  0x6a   : > { %1157 = vmatpush3.bf16.msra.mxu0 %v1331_v6  ;;  %v1340_v15 = vld [vmem:[#allocation5 + $0xa0] sm:$0xff]   ;;  %v1344_v19 = vld [vmem:[#allocation5 + $0x98] sm:$0xff]   ;;  %v1347_v22 = vld [vmem:[#allocation5 + $0x10] sm:$0xff]   ;;  %p1482_p2 = scmp.lt.s32.totalorder %s1809_s11, %s1480_s21  ;;  %p1483_p11 = scmp.lt.s32.totalorder %s1481_s22, %s1475_s5 }
  0x6b   : > { %1185 = vmatpush3.bf16.msra.mxu1 %v1332_v7  ;;  %1158 = vmatprep.subr.bf16.mxu0 %v1333_v8  ;;  %v1348_v23 = vld [vmem:[#allocation5 + $0x90] sm:$0xff]   ;;  %v1349_v24 = vld [vmem:[#allocation5 + $0x48] sm:$0xff]   ;;  %v1353_v28 = vld [vmem:[#allocation5 + $0x40] sm:$0xff]   ;;  %p1478_p10 = pneg %p1477_p7 }
  0x6c   : > { %1186 = vmatprep.subr.bf16.mxu1 %v1334_v9  ;;  %v1350_v25 = vld [vmem:[#allocation5 + $0xc8] sm:$0xff]   ;;  %v1354_v29 = vld [vmem:[#allocation5 + $0xc0] sm:$0xff]   ;;  %v245_v33 = vld [vmem:[%s1745_s9 + $0x18] sm:$0xff]  ;;  %p1484_p0 = por %p1483_p11, %p1482_p2 }
  0x6d   : > { %v1351_v26 = vld [vmem:[#allocation5 + $0x8] sm:$0xff]   ;;  %v1355_v30 = vld [vmem:[#allocation5] sm:$0xff]   ;;  %v260_v38 = vunpack.c.l.bf16 %v245_v33  ;;  %v261_v39 = vunpack.c.h.bf16 %v245_v33  ;;  %v1361_v42 = vld [vmem:[#allocation5 + $0x178] sm:$0xff]  }
  0x6e   : > { %1159 = vmatpush3.bf16.msra.mxu0 %v1335_v10  ;;  %v1352_v27 = vld [vmem:[#allocation5 + $0x88] sm:$0xff]   ;;  %v1356_v31 = vld [vmem:[#allocation5 + $0x80] sm:$0xff]   ;;  %v1362_v43 = vld [vmem:[#allocation5 + $0x138] sm:$0xff]   ;;  %p1485_p3 = pnand %p1484_p0, %p1478_p10 }
  0x6f   : > { %1187 = vmatpush3.bf16.msra.mxu1 %v1336_v11  ;;  %1160 = vmatprep.subr.bf16.mxu0 %v1337_v12  ;;  %v242_v32 = vld [vmem:[%s1745_s9] sm:$0xff]  ;;  %v243_v34 = vld [vmem:[%s1745_s9 + $0x8] sm:$0xff]  ;;  %v1363_v46 = vld [vmem:[#allocation5 + $0x170] sm:$0xff]   ;;  %v284_v51 = vmul.f32 %v260_v38, %v260_v38  ;;  %v285_v52 = vmul.f32 %v261_v39, %v261_v39 }
  0x70   : > { %1188 = vmatprep.subr.bf16.mxu1 %v1338_v13  ;;  %v254_v35 = vunpack.c.l.bf16 %v242_v32  ;;  %v255_v36 = vunpack.c.h.bf16 %v242_v32  ;;  %v1766_v37 = vld [vmem:[%s1745_s9 + $0x20] sm:$0xff]  ;;  %v1089_v40 = vcombine.high %v242_v32, %v245_v33  ;;  %v1088_v44 = vcombine.low %v242_v32, %v245_v33  ;;  %v1364_v54 = vld [vmem:[#allocation5 + $0x130] sm:$0xff]   ;;  %v1365_v55 = vld [vmem:[#allocation5 + $0x168] sm:$0xff]  }
  0x71   : > { %v1091_v41 = vcombine.high %v243_v34, %v1766_v37  ;;  %v1090_v45 = vcombine.low %v243_v34, %v1766_v37  ;;  %v256_v48 = vunpack.c.l.bf16 %v243_v34  ;;  %v262_v49 = vunpack.c.l.bf16 %v1766_v37  ;;  %v1366_v58 = vld [vmem:[#allocation5 + $0x128] sm:$0xff]   ;;  %v248_v59 = vld [vmem:[%s1745_s9 + $0x30] sm:$0xff]  ;;  %v249_v2 = vld [vmem:[%s1745_s9 + $0x38] sm:$0xff] }
  0x72   : > { %1161 = vmatpush3.bf16.msra.mxu0 %v1339_v14  ;;  %818 = vmatprep.mubr.bf16.mxu0 %v1089_v40  ;;  %v278_v47 = vmul.f32 %v254_v35, %v254_v35  ;;  %v279_v50 = vmul.f32 %v255_v36, %v255_v36  ;;  %v257_v53 = vunpack.c.h.bf16 %v243_v34  ;;  %v251_v60 = vld [vmem:[%s1745_s9 + $0x48] sm:$0xff]  ;;  %v263_v63 = vunpack.c.h.bf16 %v1766_v37  ;;  %v252_v3 = vld [vmem:[%s1745_s9 + $0x50] sm:$0xff]  ;;  %v1367_v7 = vld [vmem:[#allocation5 + $0x160] sm:$0xff]  }
  0x73   : > { %1189 = vmatpush3.bf16.msra.mxu1 %v1340_v15  ;;  %1162 = vmatprep.subr.bf16.mxu0 %v1341_v16  ;;  %v286_v56 = vmul.f32 %v262_v49, %v262_v49  ;;  %v280_v57 = vmul.f32 %v256_v48, %v256_v48  ;;  %v309_v0 = vadd.f32 %v285_v52, %v284_v51  ;;  %v266_v5 = vunpack.c.l.bf16 %v248_v59  ;;  %v1777_v32 = vld [vmem:[%s1745_s9 + $0x10] sm:$0xff]  ;;  %v1780_v34 = vld [vmem:[%s1745_s9 + $0x28] sm:$0xff]  ;;  %v1783_v35 = vld [vmem:[%s1745_s9 + $0x40] sm:$0xff] }
  0x74   : > { %1190 = vmatprep.subr.bf16.mxu1 %v1342_v17  ;;  %867 = vmatprep.mubr.bf16.mxu1 %v1091_v41  ;;  %v281_v61 = vmul.f32 %v257_v53, %v257_v53  ;;  %v302_v62 = vadd.f32 %v279_v50, %v278_v47  ;;  %v1095_v1 = vcombine.high %v248_v59, %v251_v60  ;;  %v267_v6 = vunpack.c.h.bf16 %v248_v59  ;;  %v1786_v36 = vld [vmem:[%s1745_s9 + $0x58] sm:$0xff]  ;;  %v1375_v41 = vld [vmem:[#allocation5 + $0x150] sm:$0xff]  }
  0x75   : > { %v1094_v4 = vcombine.low %v248_v59, %v251_v60  ;;  %v1097_v8 = vcombine.high %v249_v2, %v252_v3  ;;  %v1096_v9 = vcombine.low %v249_v2, %v252_v3  ;;  %v268_v10 = vunpack.c.l.bf16 %v249_v2  ;;  %v1377_v59 = vld [vmem:[#allocation5 + $0x148] sm:$0xff]  }
  0x76   : > { %1163 = vmatpush3.bf16.msra.mxu0 %v1343_v18  ;;  %v269_v11 = vunpack.c.h.bf16 %v249_v2  ;;  %v290_v12 = vmul.f32 %v266_v5, %v266_v5  ;;  %v291_v13 = vmul.f32 %v267_v6, %v267_v6  ;;  %v272_v14 = vunpack.c.l.bf16 %v251_v60  ;;  %v1379_v6 = vld [vmem:[#allocation5 + $0x140] sm:$0xff]  }
  0x77   : > { %1191 = vmatpush3.bf16.msra.mxu1 %v1344_v19  ;;  %1164 = vmatprep.subr.bf16.mxu0 %v1345_v20  ;;  %v273_v15 = vunpack.c.h.bf16 %v251_v60  ;;  %v292_v16 = vmul.f32 %v268_v10, %v268_v10  ;;  %v303_v17 = vadd.f32 %v302_v62, %v280_v57  ;;  %v274_v18 = vunpack.c.l.bf16 %v252_v3  ;;  %v1368_v20 = vld [vmem:[#allocation5 + $0x120] sm:$0xff]  }
  0x78   : > { %1192 = vmatprep.subr.bf16.mxu1 %v1346_v21  ;;  %v275_v19 = vunpack.c.h.bf16 %v252_v3  ;;  %v316_v21 = vadd.f32 %v291_v13, %v290_v12  ;;  %v258_v37 = vunpack.c.l.bf16 %v1777_v32  ;;  %v259_v38 = vunpack.c.h.bf16 %v1777_v32 }
  0x79   : > { %v304_v39 = vadd.f32 %v303_v17, %v281_v61  ;;  %v276_v51 = vunpack.c.l.bf16 %v1786_v36  ;;  %v277_v52 = vunpack.c.h.bf16 %v1786_v36  ;;  %v264_v57 = vunpack.c.l.bf16 %v1780_v34 }
  0x7a   : > { %1165 = vmatpush3.bf16.msra.mxu0 %v1347_v22  ;;  %v296_v22 = vmul.f32 %v272_v14, %v272_v14  ;;  %v299_v33 = vmul.f32 %v275_v19, %v275_v19  ;;  %v282_v47 = vmul.f32 %v258_v37, %v258_v37  ;;  %v283_v48 = vmul.f32 %v259_v38, %v259_v38 }
  0x7b   : > { %1193 = vmatpush3.bf16.msra.mxu1 %v1348_v23  ;;  %1166 = vmatprep.subr.bf16.mxu0 %v1349_v24  ;;  %v297_v23 = vmul.f32 %v273_v15, %v273_v15  ;;  %v1369_v24 = vld [vmem:[#allocation5 + $0x158] sm:$0xff]   ;;  %v300_v61 = vmul.f32 %v276_v51, %v276_v51  ;;  %v1092_v10 = vcombine.low %v1777_v32, %v1780_v34 }
  0x7c   : > { %1194 = vmatprep.subr.bf16.mxu1 %v1350_v25  ;;  %v293_v25 = vmul.f32 %v269_v11, %v269_v11  ;;  %v1098_v11 = vcombine.low %v1783_v35, %v1786_v36 }
  0x7e   : > { %1167 = vmatpush3.bf16.msra.mxu0 %v1351_v26  ;;  %v298_v26 = vmul.f32 %v274_v18, %v274_v18 }
  0x7f   : > { %1195 = vmatpush3.bf16.msra.mxu1 %v1352_v27  ;;  %1168 = vmatprep.subr.bf16.mxu0 %v1353_v28  ;;  %v317_v27 = vadd.f32 %v316_v21, %v292_v16  ;;  %v323_v28 = vadd.f32 %v297_v23, %v296_v22 }
  0x80   : > { %1196 = vmatprep.subr.bf16.mxu1 %v1354_v29  ;;  %v287_v29 = vmul.f32 %v263_v63, %v263_v63  ;;  %v301_v63 = vmul.f32 %v277_v52, %v277_v52 }
  0x81   : > { %v324_v40 = vadd.f32 %v323_v28, %v298_v26 }
  0x82   : > { %1169 = vmatpush3.bf16.msra.mxu0 %v1355_v30  ;;  %v310_v30 = vadd.f32 %v309_v0, %v286_v56  ;;  %v305_v56 = vadd.f32 %v304_v39, %v282_v47  ;;  %v288_v0 = vmul.f32 %v264_v57, %v264_v57 }
  0x83   : > { %1197 = vmatpush3.bf16.msra.mxu1 %v1356_v31  ;;  %1210 = vmatprep.subr.bf16.mxu0 %v1361_v42  ;;  %v1372_v31 = vld [vmem:[#allocation5 + $0x118] sm:$0xff]   ;;  %v325_v53 = vadd.f32 %v324_v40, %v299_v33 }
  0x84   : > { %1238 = vmatprep.subr.bf16.mxu1 %v1361_v42  ;;  %v1093_v42 = vcombine.high %v1777_v32, %v1780_v34  ;;  %v311_v49 = vadd.f32 %v310_v30, %v287_v29  ;;  %v306_v62 = vadd.f32 %v305_v56, %v283_v48  ;;  %v933_v32 = vld [vmem:[%s1756_s30] sm:$0xff] }
  0x85   : > { %819 = vmatmul.mubr.bf16.vlgmr.msra.gmra.mxu0 %v1088_v44  ;;  %v270_v44 = vunpack.c.l.bf16 %v1783_v35  ;;  %v326_v3 = vadd.f32 %v325_v53, %v300_v61  ;;  %v935_v51 = vunpack.c.1.s8 %v933_v32  ;;  %v937_v52 = vunpack.c.3.s8 %v933_v32 }
  0x86   : > { %868 = vmatmul.mubr.bf16.vlgmr.msra.gmra.mxu1 %v1090_v45  ;;  %1211 = vmatpush3.bf16.msra.mxu0 %v1362_v43  ;;  %v318_v45 = vadd.f32 %v317_v27, %v293_v25  ;;  %v312_v5 = vadd.f32 %v311_v49, %v288_v0 }
  0x87   : > { %1246 = vmatpush3.bf16.msra.mxu1 %v1362_v43  ;;  %1212 = vmatprep.subr.bf16.mxu0 %v1363_v46  ;;  %v1099_v43 = vcombine.high %v1783_v35, %v1786_v36  ;;  %v294_v50 = vmul.f32 %v270_v44, %v270_v44  ;;  %v936_v36 = vunpack.c.2.s8 %v933_v32 }
  0x88   : > { %1239 = vmatprep.subr.bf16.mxu1 %v1363_v46  ;;  %826 = vmatprep.mubr.bf16.mxu0 %v1095_v1  ;;  %v271_v46 = vunpack.c.h.bf16 %v1783_v35  ;;  %v934_v35 = vunpack.c.0.s8 %v933_v32 }
  0x89   : > { %875 = vmatprep.mubr.bf16.mxu1 %v1097_v8  ;;  %v319_v60 = vadd.f32 %v318_v45, %v294_v50  ;;  %307 = vadd.xlane.f32.xlu0 %v306_v62  ;;  %v940_v48 = vand.u32 255, %v936_v36 }
  0x8a   : > { %1213 = vmatpush3.bf16.msra.mxu0 %v1364_v54  ;;  %v938_v47 = vand.u32 255, %v934_v35 }
  0x8b   : > { %1247 = vmatpush3.bf16.msra.mxu1 %v1364_v54  ;;  %1214 = vmatprep.subr.bf16.mxu0 %v1365_v55  ;;  %v1376_v54 = vld [vmem:[#allocation5 + $0x110] sm:$0xff]   ;;  %vm944_vm1 = vcmp.ge.s32.totalorder %v940_v48, 128 }
  0x8c   : > { %1240 = vmatprep.subr.bf16.mxu1 %v1365_v55  ;;  %v295_v55 = vmul.f32 %v271_v46, %v271_v46  ;;  %vm942_vm0 = vcmp.ge.s32.totalorder %v938_v47, 128 }
  0x8d   : > { %827 = vmatmul.mubr.bf16.gmra.mxu0 %v1094_v4  ;;  %v1378_v4 = vld [vmem:[#allocation5 + $0x108] sm:$0xff]  }
  0x8e   : > { %1215 = vmatpush3.bf16.msra.mxu0 %v1366_v58  ;;  %876 = vmatmul.mubr.bf16.gmra.mxu1 %v1096_v9  ;;  %v320_v2 = vadd.f32 %v319_v60, %v295_v55  ;;  %v1380_v9 = vld [vmem:[#allocation5 + $0x100] sm:$0xff]  }
  0x8f   : > { %1248 = vmatpush3.bf16.msra.mxu1 %v1366_v58  ;;  %1216 = vmatprep.subr.bf16.mxu0 %v1367_v7  ;;  %v265_v58 = vunpack.c.h.bf16 %v1780_v34 }
  0x90   : > { %1241 = vmatprep.subr.bf16.mxu1 %v1367_v7  ;;  %916 = vmatprep.mubr.bf16.mxu0 %v1093_v42  ;;  %v327_v7 = vadd.f32 %v326_v3, %v301_v63 }
  0x91   : > { %924 = vmatprep.mubr.bf16.mxu1 %v1099_v43  ;;  %v289_v1 = vmul.f32 %v265_v58, %v265_v58  ;;  %321 = vadd.xlane.f32.xlu1 %v320_v2 }
  0x92   : > { %1217 = vmatpush3.bf16.msra.mxu0 %v1368_v20 }
  0x93   : > { %1249 = vmatpush3.bf16.msra.mxu1 %v1368_v20  ;;  %1218 = vmatprep.subr.bf16.mxu0 %v1369_v24  ;;  %v313_v8 = vadd.f32 %v312_v5, %v289_v1  ;;  %v939_v5 = vand.u32 255, %v935_v51 }
  0x94   : > { %1242 = vmatprep.subr.bf16.mxu1 %v1369_v24 }
  0x95   : > { %328 = vadd.xlane.f32.xlu1 %v327_v7  ;;  %314 = vadd.xlane.f32.xlu0 %v313_v8  ;;  %vm943_vm2 = vcmp.ge.s32.totalorder %v939_v5, 128 }
  0x96   : > { %1219 = vmatpush3.bf16.msra.mxu0 %v1372_v31 }
  0x97   : > { %1250 = vmatpush3.bf16.msra.mxu1 %v1372_v31  ;;  %1220 = vmatprep.subr.bf16.mxu0 %v1375_v41 }
  0x98   : > { %1243 = vmatprep.subr.bf16.mxu1 %v1375_v41 }
  0x9a   : > { %1221 = vmatpush3.bf16.msra.mxu0 %v1376_v54 }
  0x9b   : > { %1251 = vmatpush3.bf16.msra.mxu1 %v1376_v54  ;;  %1222 = vmatprep.subr.bf16.mxu0 %v1377_v59 }
  0x9c   : > { %1244 = vmatprep.subr.bf16.mxu1 %v1377_v59 }
  0x9e   : > { %1223 = vmatpush3.bf16.msra.mxu0 %v1378_v4 }
  0x9f   : > { %1252 = vmatpush3.bf16.msra.mxu1 %v1378_v4  ;;  %1224 = vmatprep.subr.bf16.mxu0 %v1379_v6 }
  0xa0   : > { %1245 = vmatprep.subr.bf16.mxu1 %v1379_v6  ;;  %v941_v6 = vand.u32 255, %v937_v52 }
  0xa2   : > { %1225 = vmatpush3.bf16.msra.mxu0 %v1380_v9  ;;  %vm945_vm3 = vcmp.ge.s32.totalorder %v941_v6, 128 }
  0xa3   : > { %1253 = vmatpush3.bf16.msra.mxu1 %v1380_v9 }
  0xa5   : > { %917 = vmatmul.mubr.bf16.vlgmr.msra.gmra.mxu0 %v1092_v10 }
  0xa6   : > { %925 = vmatmul.mubr.bf16.vlgmr.msra.gmra.mxu1 %v1098_v11 }
 0x112   : > { %v308_v17 = vpop.xlane.xlu0 %307 }
 0x113   : > { %v330_v21 = vmax.f32 %v308_v17, 1e-24 }
 0x11a   : > { %v322_v14 = vpop.xlane.xlu1 %321 }
 0x11b   : > { %v332_v20 = vmax.f32 %v322_v14, 1e-24 }
 0x11d   : > { %1385 = vrsqrt.f32 %v332_v20 }
 0x11e   : > { %v329_v22 = vpop.xlane.xlu1 %328  ;;  %v315_v23 = vpop.xlane.xlu0 %314  ;;  %1387 = vrsqrt.f32 %v330_v21 }
 0x11f   : > { %v333_v26 = vmax.f32 %v329_v22, 1e-24  ;;  %v331_v29 = vmax.f32 %v315_v23, 1e-24 }
 0x121   : > { %1389 = vrsqrt.f32 %v333_v26 }
 0x122   : > { %1391 = vrsqrt.f32 %v331_v29 }
 0x12a   : > { %v1386_v37 = vpop.eup %1385 }
 0x12b   : > { %v1388_v38 = vpop.eup %1387  ;;  %v340_v49 = vmul.f32 2.0, %v1386_v37 }
 0x12c   : > { %v338_v50 = vmul.f32 2.0, %v1388_v38 }
 0x12e   : > { %v1390_v53 = vpop.eup %1389 }
 0x12f   : > { %v1392_v60 = vpop.eup %1391  ;;  %v341_v8 = vmul.f32 2.0, %v1390_v53 }
 0x130   : > { %v339_v10 = vmul.f32 2.0, %v1392_v60 }
 0x145   : > { %v1170_v12 = vpop.f32.mrf.mxu0 }
 0x146   : > { %v1198_v13 = vpop.f32.mrf.mxu1 }
 0x147   : > { %v1171_v15 = vpop.f32.mrf.mxu0 }
 0x148   : > { %v1199_v16 = vpop.f32.mrf.mxu1  ;;  %v1172_v41 = vadd.f32 %v1171_v15, %v1170_v12 }
 0x149   : > { %v1173_v18 = vpop.f32.mrf.mxu0  ;;  %v1200_v42 = vadd.f32 %v1199_v16, %v1198_v13 }
 0x14a   : > { %v1201_v19 = vpop.f32.mrf.mxu1 }
 0x14b   : > { %v1174_v24 = vpop.f32.mrf.mxu0  ;;  %v870_v61 = vadd.f32 %v1200_v42, %v1172_v41 }
 0x14c   : > { %v1202_v25 = vpop.f32.mrf.mxu1  ;;  %v1175_v54 = vadd.f32 %v1174_v24, %v1173_v18 }
 0x14d   : > { %v1176_v27 = vpop.f32.mrf.mxu0  ;;  %v1203_v55 = vadd.f32 %v1202_v25, %v1201_v19 }
 0x14e   : > { %v1204_v28 = vpop.f32.mrf.mxu1 }
 0x14f   : > { %v1177_v30 = vpop.f32.mrf.mxu0  ;;  %v873_v7 = vadd.f32 %v1203_v55, %v1175_v54 }
 0x150   : > { %v1205_v31 = vpop.f32.mrf.mxu1  ;;  %v1178_v43 = vadd.f32 %v1177_v30, %v1176_v27 }
 0x151   : > { %v1179_v33 = vpop.f32.mrf.mxu0  ;;  %v1206_v44 = vadd.f32 %v1205_v31, %v1204_v28 }
 0x152   : > { %v1207_v34 = vpop.f32.mrf.mxu1 }
 0x153   : > { %v1180_v39 = vpop.f32.mrf.mxu0  ;;  %v878_v62 = vadd.f32 %v1206_v44, %v1178_v43 }
 0x154   : > { %v1208_v40 = vpop.f32.mrf.mxu1  ;;  %v1181_v56 = vadd.f32 %v1180_v39, %v1179_v33 }
 0x155   : > { %v1209_v57 = vadd.f32 %v1208_v40, %v1207_v34 }
 0x157   : > { %v881_v9 = vadd.f32 %v1209_v57, %v1181_v56 }
 0x165   : > { %v1226_v45 = vpop.f32.mrf.mxu0 }
 0x166   : > { %v1232_v46 = vpop.f32.mrf.mxu1 }
 0x167   : > { %v1227_v58 = vpop.f32.mrf.mxu0 }
 0x168   : > { %v1233_v59 = vpop.f32.mrf.mxu1  ;;  %v1228_v63 = vadd.f32 %v1227_v58, %v1226_v45 }
 0x169   : > { %v1234_v0 = vadd.f32 %v1233_v59, %v1232_v46  ;;  %v1229_v1 = vpop.f32.mrf.mxu0 }
 0x16a   : > { %v1235_v2 = vpop.f32.mrf.mxu1  ;;  %v919_v3 = vadd.f32 %v1228_v63, %v870_v61 }
 0x16b   : > { %v927_v4 = vadd.f32 %v1234_v0, %v878_v62  ;;  %v1230_v11 = vpop.f32.mrf.mxu0 }
 0x16c   : > { %v1236_v12 = vpop.f32.mrf.mxu1  ;;  %v946_v13 = vmul.f32 %v919_v3, %v338_v50  ;;  %v1231_v15 = vadd.f32 %v1230_v11, %v1229_v1 }
 0x16d   : > { %v948_v14 = vmul.f32 %v927_v4, %v340_v49  ;;  %v1237_v16 = vadd.f32 %v1236_v12, %v1235_v2 }
 0x16e   : > { %v950_v17 = vsel %vm942_vm0, %v946_v13, 0.0  ;;  %v922_v19 = vadd.f32 %v1231_v15, %v873_v7 }
 0x16f   : > { %v952_v18 = vsel %vm944_vm1, %v948_v14, 0.0  ;;  %v930_v20 = vadd.f32 %v1237_v16, %v881_v9  ;;  %954 = vst [vmem:[%s238_s29] sm:$0xff] %v950_v17 }
 0x170   : > { %956 = vst [vmem:[%s238_s29 + $0x10] sm:$0xff] %v952_v18  ;;  %v947_v21 = vmul.f32 %v922_v19, %v339_v10 }
 0x171   : > { %v949_v22 = vmul.f32 %v930_v20, %v341_v8 }
 0x172   : > { %v951_v23 = vsel %vm943_vm2, %v947_v21, 0.0 }
 0x173   : > { %v953_v24 = vsel %vm945_vm3, %v949_v22, 0.0  ;;  %955 = vst [vmem:[%s238_s29 + $0x8] sm:$0xff] %v951_v23 }
 0x174   : > { %957 = vst [vmem:[%s238_s29 + $0x18] sm:$0xff] %v953_v24 }
 0x175   : > { %1488 = shalt.err (!%p1485_p3)
}
 0x176   : > { %s1489_s25 = scalar_lea.hbm %s1814_s17, 512  ;;  %s1493_s9 = scalar_lea.hbm %s1860_s3, 1024 }
 0x177   : > { %p1490_p12 = scmp.ne.s32.totalorder %s1814_s17, %s1489_s25  ;;  %p1494_p1 = scmp.lt.s32.totalorder %s1814_s17, %s1860_s3 }
 0x178   : > { %p1495_p6 = scmp.lt.s32.totalorder %s1493_s9, %s1489_s25 }
 0x179   : > { %p1491_p13 = pnand %p1490_p12, %p1876_p9 }
 0x17a   : > { %p1496_p4 = por %p1495_p6, %p1494_p1 }
 0x17b   : > { %p1492_p8 = pneg %p1491_p13 }
 0x17d   : > { %p1497_p5 = pnand %p1496_p4, %p1492_p8 }
 0x17f   : > { %1500 = shalt.err (!%p1497_p5)
}
 0x180   : > { %s1557_s26 = smov 128   ;;  %s1558_s29 = smov 8  }
 0x181   : > { %1265 = dma.vmem_to_hbm [thread:$0]  (%p1876_p9), %s1809_s11, 512, %s1814_s17, %s959_s20, %s1557_s26, %s1557_s26, %s1558_s29  }
 0x182 PF: > { %s987_s18 = sand.u32 1, %s1535_s12   ;;  %p1877_p7 = scmp.ne.s32.totalorder %s1868_s28, 0 }
 0x183   : > { %p1878_p10 = scmp.ge.s32.totalorder %s1547_s15, 2  ;;  %s988_s24 = scalar_lea.sflag [#allocation4], %s987_s18 }
 0x185   : > { %p1279_p2 = pnand %p1878_p10, %p1877_p7 }
 0x187   : > { %p1280_p11 = pneg %p1279_p2 }
 0x189   : > { %1530 = dma.done.wait (%p1280_p11), %s988_s24, 512  }
 0x18a   : > { %1532 = vsyncadd (%p1280_p11), %s988_s24, 4294966784  ;;  %p17_p0 = scmp.ge.s32.totalorder %s1600_s16, 4   ;;  %s1879_s12 = smov %s1539_s13 }
 0x18b   : > { %s1880_s13 = smov %s1543_s14  ;;  %s1881_s14 = smov %s1611_s19 }
 0x18c   : > { %s1882_s15 = smov %s1600_s16  ;;  %19 = sbr.rel (!%p17_p0) target bundleno = 6 (0x6), region = 92 }
 0x191   :  { %993 = vsyncpa [#allocation3], 1 }
 0x192   :  { %995 = vsyncpa [#allocation3 + $0x1], 1 }
 0x193   :  { %996 = vsyncpa [#allocation6], 1 }
 0x194   :  { %997 = vsyncpa [#allocation4], 1 }
 0x195   :  { %999 = vsyncpa [#allocation4 + $0x1], 1 }

</bundles_post_ra>
